<compile_context>
chip_gen: v5e
topology: v5e:2x2
jax: 0.10.0
libtpu: 0.0.40
codegen_flags: <defaults>
</compile_context>

<pallas_src>
import functools
import math

import jax
import jax.numpy as jnp
from jax.experimental import pallas as pl
from jax.experimental.pallas import tpu as pltpu


def _infonce_kernel(hy_ref, hxt_ref, hx_ref, w2c_ref, w2r_ref, b2_ref,
                    out_ref, m_ref, l_ref, *, pairwise_dtype):
    """Grid = (row tiles i  [parallel], column tiles j [arbitrary])."""
    j = pl.program_id(1)
    nj = pl.num_programs(1)
    b2 = b2_ref[0]

    # ---- per-row-tile init of the running logsumexp state ----
    @pl.when(j == 0)
    def _init():
        m_ref[...] = jnp.full(m_ref.shape, -jnp.inf, jnp.float32)
        l_ref[...] = jnp.zeros(l_ref.shape, jnp.float32)

    # ---- pairwise scores for this (row tile, column tile) ----
    # Layout: (tb, H, tj) with the column/pairwise axis on the 128-lane dim.
    hy = hy_ref[...].astype(pairwise_dtype)      # (tb, H)  (b1 already folded in)
    hxt = hxt_ref[...].astype(pairwise_dtype)    # (H, tj)
    w2c = w2c_ref[...].astype(pairwise_dtype)    # (H, 1)

    pre = hy[:, :, None] + hxt[None, :, :]                      # (tb, H, tj)
    h = jnp.maximum(pre, 0.0)                                    # ReLU
    hw = (h * w2c[None, :, :]).astype(jnp.float32)               # weight by w2
    z = jnp.sum(hw, axis=1) + b2                                 # (tb, tj), f32
    t1 = jnp.maximum(z, 0.0) + jnp.log(1.0 + jnp.exp(-jnp.abs(z)))  # softplus

    # ---- online (running) logsumexp over the column axis ----
    m_prev = m_ref[...]                                          # (tb, 1)
    m_new = jnp.maximum(m_prev, jnp.max(t1, axis=-1, keepdims=True))
    l_ref[...] = (l_ref[...] * jnp.exp(m_prev - m_new)
                  + jnp.sum(jnp.exp(t1 - m_new), axis=-1, keepdims=True))
    m_ref[...] = m_new

    # ---- finalize this row tile: T0 (diagonal pairs) + partial sums ----
    @pl.when(j == nj - 1)
    def _finalize():
        lse = m_ref[...] + jnp.log(l_ref[...])                   # (tb, 1)
        # T0 directly from the row tile (f32, O(tb*H)); no iota/diagonal mask.
        h0 = jnp.maximum(hx_ref[...] + hy_ref[...], 0.0)         # (tb, H)
        z0 = jnp.sum(h0 * w2r_ref[...], axis=-1, keepdims=True) + b2
        t0 = jnp.maximum(z0, 0.0) + jnp.log(1.0 + jnp.exp(-jnp.abs(z0)))
        out_ref[0, 0] = jnp.sum(t0)
        out_ref[0, 1] = jnp.sum(lse)


def _choose_tiles(B, H, tb, tj):
    """Pick row/column tiles that respect (8, 128) layout rules and VMEM."""
    if tb is None:
        tb = 128 if (B % 128 == 0 and B > 128) else B
    if tj is None:
        if B % 128 == 0 and B > 128:
            tj = 128
            # Grow the column tile while the f32 pairwise chain stays modest
            # (budget chosen so it also fits v7x's smaller VMEM).
            while (B % (tj * 2) == 0 and tj * 2 < B
                   and 4 * tb * (tj * 2) * H * 4 <= 24 * 1024 * 1024):
                tj *= 2
        else:
            tj = B
    assert B % tb == 0 and B % tj == 0, "tiles must divide the batch"
    assert tb == B or tb % 8 == 0, "row tile must be a multiple of 8 sublanes"
    assert tj == B or tj % 128 == 0, "column tile must be a multiple of 128 lanes"
    return tb, tj


def infonce_forward(x, y, w1, b1, w2, b2, *, tb=None, tj=None,
                    pairwise_dtype=jnp.float32):
    """InfoNCE lower bound.  w1: (x_dim+y_dim, H), b1: (H,), w2: (H,), b2: ()."""
    B, x_dim = x.shape
    H = w1.shape[1]

    # First-layer projections hoisted out of the kernel (O(B*d*H) << O(B^2*H));
    # keeps the kernel free of cross-tile init state (megacore-friendly).
    w1 = w1.astype(jnp.float32)
    hx = jnp.dot(x.astype(jnp.float32), w1[:x_dim])                   # (B, H)
    hy = jnp.dot(y.astype(jnp.float32), w1[x_dim:]) + b1.reshape(1, H)  # b1 folded
    hxt = hx.T                                                        # (H, B)

    tb, tj = _choose_tiles(B, H, tb, tj)
    n_i, n_j = B // tb, B // tj

    w2c = w2.reshape(H, 1).astype(jnp.float32)
    w2r = w2.reshape(1, H).astype(jnp.float32)
    b2_arr = jnp.asarray(b2, jnp.float32).reshape(1)

    # Explicit VMEM budget: ~4 live copies of the (tb, H, tj) f32 chain,
    # double-buffered input tiles, capped at 48 MiB (fits v5e/v6e/v7x).
    pairwise_bytes = 4 * tb * tj * H * 4
    io_bytes = 2 * 4 * (2 * tb * H + H * tj) + (2 << 20)
    vmem_limit = int(min(max(pairwise_bytes + io_bytes, 32 * 1024 * 1024),
                         48 * 1024 * 1024))

    kernel = functools.partial(_infonce_kernel, pairwise_dtype=pairwise_dtype)

    partials = pl.pallas_call(
        kernel,
        out_shape=jax.ShapeDtypeStruct((n_i, 2), jnp.float32),
        grid_spec=pltpu.PrefetchScalarGridSpec(
            num_scalar_prefetch=0,
            grid=(n_i, n_j),
            in_specs=[
                pl.BlockSpec((tb, H), lambda i, j: (i, 0)),    # Hy row tile
                pl.BlockSpec((H, tj), lambda i, j: (0, j)),    # Hx^T column tile
                pl.BlockSpec((tb, H), lambda i, j: (i, 0)),    # Hx row tile (T0)
                pl.BlockSpec((H, 1), lambda i, j: (0, 0)),     # w2 (column layout)
                pl.BlockSpec((1, H), lambda i, j: (0, 0)),     # w2 (row layout)
                pl.BlockSpec(memory_space=pltpu.MemorySpace.SMEM),  # b2 scalar
            ],
            out_specs=pl.BlockSpec((1, 2), lambda i, j: (i, 0),
                                   memory_space=pltpu.MemorySpace.SMEM),
            scratch_shapes=[
                pltpu.VMEM((tb, 1), jnp.float32),   # running max  m
                pltpu.VMEM((tb, 1), jnp.float32),   # running sum  l
            ],
        ),
        compiler_params=pltpu.CompilerParams(
            dimension_semantics=("parallel", "arbitrary"),
            vmem_limit_bytes=vmem_limit),
    )(hy, hxt, hx, w2c, w2r, b2_arr)

    # Final 2-element reduction + scalar combine in plain JAX.
    t0_mean = jnp.sum(partials[:, 0]) / B
    lse_mean = jnp.sum(partials[:, 1]) / B
    return t0_mean - (lse_mean - math.log(B))


# -------------------------- host-side helpers --------------------------

def init_linear(key, in_dim, out_dim):
    """PyTorch nn.Linear init; weight stored transposed as (in_dim, out_dim)."""
    kw, kb = jax.random.split(key)
    bound = 1.0 / math.sqrt(in_dim)
    w = jax.random.uniform(kw, (in_dim, out_dim), jnp.float32, -bound, bound)
    b = jax.random.uniform(kb, (out_dim,), jnp.float32, -bound, bound)
    return w, b


def ref_forward(x, y, w1, b1, w2, b2):
    """Pure-JAX mirror of the PyTorch InfoNCE.forward."""
    B = x.shape[0]

    def f(inp):
        h = jnp.maximum(inp @ w1 + b1, 0.0)
        z = h @ w2.reshape(-1, 1) + b2
        return jnp.logaddexp(z, 0.0)                     # Softplus

    x_tile = jnp.broadcast_to(x[None, :, :], (B, B, x.shape[1]))
    y_tile = jnp.broadcast_to(y[:, None, :], (B, B, y.shape[1]))
    T0 = f(jnp.concatenate([x, y], axis=-1))             # (B, 1)
    T1 = f(jnp.concatenate([x_tile, y_tile], axis=-1))   # (B, B, 1)
    lse = jax.scipy.special.logsumexp(T1, axis=1)        # (B, 1)
    return T0.mean() - (lse.mean() - jnp.log(jnp.float32(B)))


if __name__ == "__main__":
    x_dim, y_dim, hidden = 16, 16, 32
    root = jax.random.PRNGKey(0)
    k1, k2, k3, k4, k5, k6 = jax.random.split(root, 6)

    w1, b1 = init_linear(k1, x_dim + y_dim, hidden)       # Linear(x+y -> H)
    w2_full, b2_full = init_linear(k2, hidden, 1)         # Linear(H -> 1)
    w2 = w2_full[:, 0]                                    # (H,)
    b2 = b2_full[0]                                       # scalar

    ok = True

    # Case 1: small batch -> single tile on both grid axes.
    B1 = 8
    x1 = jax.random.normal(k3, (B1, x_dim), jnp.float32)
    y1 = jax.random.normal(k4, (B1, y_dim), jnp.float32)
    got1 = jax.block_until_ready(infonce_forward(x1, y1, w1, b1, w2, b2))
    want1 = ref_forward(x1, y1, w1, b1, w2, b2)
    ok &= bool(jnp.allclose(got1, want1, atol=1e-4, rtol=1e-4))

    # Case 2: 2x2 grid (tb=tj=128) -> exercises the online logsumexp across
    # column tiles and the per-row-tile partial outputs (parallel i axis).
    B2 = 256
    x2 = jax.random.normal(k5, (B2, x_dim), jnp.float32)
    y2 = jax.random.normal(k6, (B2, y_dim), jnp.float32)
    got2 = jax.block_until_ready(infonce_forward(x2, y2, w1, b1, w2, b2))
    want2 = ref_forward(x2, y2, w1, b1, w2, b2)
    ok &= bool(jnp.allclose(got2, want2, atol=1e-4, rtol=1e-4))

    assert ok, ((got1, want1), (got2, want2))
    print("KERNEL_OK")
</pallas_src>

<mosaic_0001>
module attributes {stable_mosaic.version = 11 : i64} {
  func.func @_infonce_kernel(%arg0: i32, %arg1: i32, %arg2: memref<8x32xf32, #tpu.memory_space<vmem>>, %arg3: memref<32x8xf32, #tpu.memory_space<vmem>>, %arg4: memref<8x32xf32, #tpu.memory_space<vmem>>, %arg5: memref<32x1xf32, #tpu.memory_space<vmem>>, %arg6: memref<1x32xf32, #tpu.memory_space<vmem>>, %arg7: memref<1xf32, #tpu.memory_space<smem>>, %arg8: memref<1x2xf32, #tpu.memory_space<smem>>, %arg9: memref<8x1xf32, #tpu.memory_space<vmem>>, %arg10: memref<8x1xf32, #tpu.memory_space<vmem>>) attributes {dimension_semantics = [#tpu.dimension_semantics<parallel>, #tpu.dimension_semantics<arbitrary>], iteration_bounds = array<i64: 1, 1>, scalar_prefetch = 0 : i64, scratch_operands = 2 : i64, tpu.core_type = #tpu.core_type<tc>, window_params = [{transform_indices = @transform_0, window_bounds = array<i64: 8, 32>}, {transform_indices = @transform_1, window_bounds = array<i64: 32, 8>}, {transform_indices = @transform_2, window_bounds = array<i64: 8, 32>}, {pipeline_mode = #tpu.pipeline_mode<synchronous>, transform_indices = @transform_3, window_bounds = array<i64: 32, 1>}, {pipeline_mode = #tpu.pipeline_mode<synchronous>, transform_indices = @transform_4, window_bounds = array<i64: 1, 32>}, {transform_indices = @transform_5, window_bounds = array<i64: 1>}, {transform_indices = @transform_6, window_bounds = array<i64: 1, 2>}]} {
    %c0 = arith.constant 0 : index
    %0 = memref.load %arg7[%c0] : memref<1xf32, #tpu.memory_space<smem>>
    %c0_i32 = arith.constant 0 : i32
    %1 = arith.cmpi eq, %arg1, %c0_i32 : i32
    %2 = arith.extui %1 : i1 to i32
    %c0_i32_0 = arith.constant 0 : i32
    %3 = arith.cmpi ne, %2, %c0_i32_0 : i32
    scf.if %3 {
      %cst_23 = arith.constant 0xFF800000 : f32
      %49 = vector.broadcast %cst_23 : f32 to vector<8x1xf32>
      %c0_24 = arith.constant 0 : index
      %c0_25 = arith.constant 0 : index
      %50 = vector.load %arg9[%c0_24, %c0_25] : memref<8x1xf32, #tpu.memory_space<vmem>>, vector<8x1xf32>
      tpu.vector_store %arg9[%c0_24, %c0_25], %49 {strides = array<i32>} : memref<8x1xf32, #tpu.memory_space<vmem>>, vector<8x1xf32>,
      %cst_26 = arith.constant 0.000000e+00 : f32
      %51 = vector.broadcast %cst_26 : f32 to vector<8x1xf32>
      %c0_27 = arith.constant 0 : index
      %c0_28 = arith.constant 0 : index
      %52 = vector.load %arg10[%c0_27, %c0_28] : memref<8x1xf32, #tpu.memory_space<vmem>>, vector<8x1xf32>
      tpu.vector_store %arg10[%c0_27, %c0_28], %51 {strides = array<i32>} : memref<8x1xf32, #tpu.memory_space<vmem>>, vector<8x1xf32>,
    } else {
    }
    %c0_1 = arith.constant 0 : index
    %c0_2 = arith.constant 0 : index
    %4 = vector.load %arg2[%c0_1, %c0_2] : memref<8x32xf32, #tpu.memory_space<vmem>>, vector<8x32xf32>
    %c0_3 = arith.constant 0 : index
    %c0_4 = arith.constant 0 : index
    %5 = vector.load %arg3[%c0_3, %c0_4] : memref<32x8xf32, #tpu.memory_space<vmem>>, vector<32x8xf32>
    %c0_5 = arith.constant 0 : index
    %c0_6 = arith.constant 0 : index
    %6 = vector.load %arg5[%c0_5, %c0_6] : memref<32x1xf32, #tpu.memory_space<vmem>>, vector<32x1xf32>
    %7 = vector.shape_cast %4 : vector<8x32xf32> to vector<8x32x1xf32>
    %8 = vector.shape_cast %5 : vector<32x8xf32> to vector<1x32x8xf32>
    %9 = vector.broadcast %7 : vector<8x32x1xf32> to vector<8x32x8xf32>
    %10 = vector.broadcast %8 : vector<1x32x8xf32> to vector<8x32x8xf32>
    %11 = arith.addf %9, %10 : vector<8x32x8xf32>
    %cst = arith.constant 0.000000e+00 : f32
    %12 = vector.broadcast %cst : f32 to vector<8x32x8xf32>
    %13 = arith.maximumf %11, %12 : vector<8x32x8xf32>
    %14 = vector.shape_cast %6 : vector<32x1xf32> to vector<1x32x1xf32>
    %15 = vector.broadcast %14 : vector<1x32x1xf32> to vector<8x32x8xf32>
    %16 = arith.mulf %13, %15 : vector<8x32x8xf32>
    %cst_7 = arith.constant dense<0.000000e+00> : vector<8x8xf32>
    %17 = vector.multi_reduction <add>, %16, %cst_7 [1] : vector<8x32x8xf32> to vector<8x8xf32>
    %18 = vector.broadcast %0 : f32 to vector<8x8xf32>
    %19 = arith.addf %17, %18 : vector<8x8xf32>
    %cst_8 = arith.constant 0.000000e+00 : f32
    %20 = vector.broadcast %cst_8 : f32 to vector<8x8xf32>
    %21 = arith.maximumf %19, %20 : vector<8x8xf32>
    %22 = math.absf %19 : vector<8x8xf32>
    %cst_9 = arith.constant 0.000000e+00 : f32
    %23 = vector.broadcast %cst_9 : f32 to vector<8x8xf32>
    %24 = arith.subf %23, %22 : vector<8x8xf32>
    %25 = math.exp %24 : vector<8x8xf32>
    %cst_10 = arith.constant 1.000000e+00 : f32
    %26 = vector.broadcast %cst_10 : f32 to vector<8x8xf32>
    %27 = arith.addf %26, %25 : vector<8x8xf32>
    %28 = math.log %27 : vector<8x8xf32>
    %29 = arith.addf %21, %28 : vector<8x8xf32>
    %c0_11 = arith.constant 0 : index
    %c0_12 = arith.constant 0 : index
    %30 = vector.load %arg9[%c0_11, %c0_12] : memref<8x1xf32, #tpu.memory_space<vmem>>, vector<8x1xf32>
    %cst_13 = arith.constant dense<0xFF800000> : vector<8xf32>
    %31 = vector.multi_reduction <maximumf>, %29, %cst_13 [1] : vector<8x8xf32> to vector<8xf32>
    %32 = vector.shape_cast %31 : vector<8xf32> to vector<8x1xf32>
    %33 = arith.maximumf %30, %32 : vector<8x1xf32>
    %c0_14 = arith.constant 0 : index
    %c0_15 = arith.constant 0 : index
    %34 = vector.load %arg10[%c0_14, %c0_15] : memref<8x1xf32, #tpu.memory_space<vmem>>, vector<8x1xf32>
    %35 = arith.subf %30, %33 : vector<8x1xf32>
    %36 = math.exp %35 : vector<8x1xf32>
    %37 = arith.mulf %34, %36 : vector<8x1xf32>
    %38 = vector.broadcast %33 : vector<8x1xf32> to vector<8x8xf32>
    %39 = arith.subf %29, %38 : vector<8x8xf32>
    %40 = math.exp %39 : vector<8x8xf32>
    %cst_16 = arith.constant dense<0.000000e+00> : vector<8xf32>
    %41 = vector.multi_reduction <add>, %40, %cst_16 [1] : vector<8x8xf32> to vector<8xf32>
    %42 = vector.shape_cast %41 : vector<8xf32> to vector<8x1xf32>
    %43 = arith.addf %37, %42 : vector<8x1xf32>
    %c0_17 = arith.constant 0 : index
    %c0_18 = arith.constant 0 : index
    %44 = vector.load %arg10[%c0_17, %c0_18] : memref<8x1xf32, #tpu.memory_space<vmem>>, vector<8x1xf32>
    tpu.vector_store %arg10[%c0_17, %c0_18], %43 {strides = array<i32>} : memref<8x1xf32, #tpu.memory_space<vmem>>, vector<8x1xf32>,
    %c0_19 = arith.constant 0 : index
    %c0_20 = arith.constant 0 : index
    %45 = vector.load %arg9[%c0_19, %c0_20] : memref<8x1xf32, #tpu.memory_space<vmem>>, vector<8x1xf32>
    tpu.vector_store %arg9[%c0_19, %c0_20], %33 {strides = array<i32>} : memref<8x1xf32, #tpu.memory_space<vmem>>, vector<8x1xf32>,
    %c0_i32_21 = arith.constant 0 : i32
    %46 = arith.cmpi eq, %arg1, %c0_i32_21 : i32
    %47 = arith.extui %46 : i1 to i32
    %c0_i32_22 = arith.constant 0 : i32
    %48 = arith.cmpi ne, %47, %c0_i32_22 : i32
    scf.if %48 {
      %c0_23 = arith.constant 0 : index
      %c0_24 = arith.constant 0 : index
      %49 = vector.load %arg9[%c0_23, %c0_24] : memref<8x1xf32, #tpu.memory_space<vmem>>, vector<8x1xf32>
      %c0_25 = arith.constant 0 : index
      %c0_26 = arith.constant 0 : index
      %50 = vector.load %arg10[%c0_25, %c0_26] : memref<8x1xf32, #tpu.memory_space<vmem>>, vector<8x1xf32>
      %51 = math.log %50 : vector<8x1xf32>
      %52 = arith.addf %49, %51 : vector<8x1xf32>
      %c0_27 = arith.constant 0 : index
      %c0_28 = arith.constant 0 : index
      %53 = vector.load %arg4[%c0_27, %c0_28] : memref<8x32xf32, #tpu.memory_space<vmem>>, vector<8x32xf32>
      %c0_29 = arith.constant 0 : index
      %c0_30 = arith.constant 0 : index
      %54 = vector.load %arg2[%c0_29, %c0_30] : memref<8x32xf32, #tpu.memory_space<vmem>>, vector<8x32xf32>
      %55 = arith.addf %53, %54 : vector<8x32xf32>
      %cst_31 = arith.constant 0.000000e+00 : f32
      %56 = vector.broadcast %cst_31 : f32 to vector<8x32xf32>
      %57 = arith.maximumf %55, %56 : vector<8x32xf32>
      %c0_32 = arith.constant 0 : index
      %c0_33 = arith.constant 0 : index
      %58 = vector.load %arg6[%c0_32, %c0_33] : memref<1x32xf32, #tpu.memory_space<vmem>>, vector<1x32xf32>
      %59 = vector.broadcast %58 : vector<1x32xf32> to vector<8x32xf32>
      %60 = arith.mulf %57, %59 : vector<8x32xf32>
      %cst_34 = arith.constant dense<0.000000e+00> : vector<8xf32>
      %61 = vector.multi_reduction <add>, %60, %cst_34 [1] : vector<8x32xf32> to vector<8xf32>
      %62 = vector.shape_cast %61 : vector<8xf32> to vector<8x1xf32>
      %63 = vector.broadcast %0 : f32 to vector<8x1xf32>
      %64 = arith.addf %62, %63 : vector<8x1xf32>
      %cst_35 = arith.constant 0.000000e+00 : f32
      %65 = vector.broadcast %cst_35 : f32 to vector<8x1xf32>
      %66 = arith.maximumf %64, %65 : vector<8x1xf32>
      %67 = math.absf %64 : vector<8x1xf32>
      %cst_36 = arith.constant 0.000000e+00 : f32
      %68 = vector.broadcast %cst_36 : f32 to vector<8x1xf32>
      %69 = arith.subf %68, %67 : vector<8x1xf32>
      %70 = math.exp %69 : vector<8x1xf32>
      %cst_37 = arith.constant 1.000000e+00 : f32
      %71 = vector.broadcast %cst_37 : f32 to vector<8x1xf32>
      %72 = arith.addf %71, %70 : vector<8x1xf32>
      %73 = math.log %72 : vector<8x1xf32>
      %74 = arith.addf %66, %73 : vector<8x1xf32>
      %75 = vector.shape_cast %74 : vector<8x1xf32> to vector<1x8x1xf32>
      %cst_38 = arith.constant dense<0.000000e+00> : vector<1xf32>
      %76 = vector.multi_reduction <add>, %75, %cst_38 [1, 2] : vector<1x8x1xf32> to vector<1xf32>
      %77 = vector.shape_cast %76 : vector<1xf32> to vector<1x1x1xf32>
      %78 = vector.extract %77[0, 0, 0] : f32 from vector<1x1x1xf32>
      %c0_39 = arith.constant 0 : index
      %c0_40 = arith.constant 0 : index
      %79 = memref.load %arg8[%c0_39, %c0_40] : memref<1x2xf32, #tpu.memory_space<smem>>
      memref.store %78, %arg8[%c0_39, %c0_40] : memref<1x2xf32, #tpu.memory_space<smem>>
      %80 = vector.shape_cast %52 : vector<8x1xf32> to vector<1x8x1xf32>
      %cst_41 = arith.constant dense<0.000000e+00> : vector<1xf32>
      %81 = vector.multi_reduction <add>, %80, %cst_41 [1, 2] : vector<1x8x1xf32> to vector<1xf32>
      %82 = vector.shape_cast %81 : vector<1xf32> to vector<1x1x1xf32>
      %83 = vector.extract %82[0, 0, 0] : f32 from vector<1x1x1xf32>
      %c0_42 = arith.constant 0 : index
      %c1 = arith.constant 1 : index
      %84 = memref.load %arg8[%c0_42, %c1] : memref<1x2xf32, #tpu.memory_space<smem>>
      memref.store %83, %arg8[%c0_42, %c1] : memref<1x2xf32, #tpu.memory_space<smem>>
    } else {
    }
    return
  }
  func.func @transform_0(%arg0: i32, %arg1: i32) -> (i32, i32) {
    %c0_i32 = arith.constant 0 : i32
    %c0_i32_0 = arith.constant 0 : i32
    return %arg0, %c0_i32 : i32, i32
  }
  func.func @transform_1(%arg0: i32, %arg1: i32) -> (i32, i32) {
    %c0_i32 = arith.constant 0 : i32
    %c0_i32_0 = arith.constant 0 : i32
    return %c0_i32, %arg1 : i32, i32
  }
  func.func @transform_2(%arg0: i32, %arg1: i32) -> (i32, i32) {
    %c0_i32 = arith.constant 0 : i32
    %c0_i32_0 = arith.constant 0 : i32
    return %arg0, %c0_i32 : i32, i32
  }
  func.func @transform_3(%arg0: i32, %arg1: i32) -> (i32, i32) {
    %c0_i32 = arith.constant 0 : i32
    %c0_i32_0 = arith.constant 0 : i32
    %c0_i32_1 = arith.constant 0 : i32
    return %c0_i32, %c0_i32_0 : i32, i32
  }
  func.func @transform_4(%arg0: i32, %arg1: i32) -> (i32, i32) {
    %c0_i32 = arith.constant 0 : i32
    %c0_i32_0 = arith.constant 0 : i32
    %c0_i32_1 = arith.constant 0 : i32
    return %c0_i32, %c0_i32_0 : i32, i32
  }
  func.func @transform_5(%arg0: i32, %arg1: i32) -> i32 {
    %c0_i32 = arith.constant 0 : i32
    %c0_i32_0 = arith.constant 0 : i32
    return %c0_i32 : i32
  }
  func.func @transform_6(%arg0: i32, %arg1: i32) -> (i32, i32) {
    %c0_i32 = arith.constant 0 : i32
    %c0_i32_0 = arith.constant 0 : i32
    return %arg0, %c0_i32 : i32, i32
  }
}

</mosaic_0001>

<bundles_post_ra>
// kernel: tpu_custom_call.1
= control target key start
LH: loop header
LB: loop body
LE: loop exit
PB: predicated region body
PF: predicated region fallthrough
CT: control target
= control target key end

     0   :  { %v43_v0 = vlaneseq  ;;  %s1186_s0 = inlined_call_operand.vmem [shape: f32[8,32], index: 0, kind: input, shape index: {}]   ;;  %s1187_s1 = inlined_call_operand.vmem [shape: f32[32,8], index: 1, kind: input, shape index: {}]   ;;  %s1188_s2 = inlined_call_operand.vmem [shape: f32[8,32], index: 2, kind: input, shape index: {}]   ;;  %s1189_s3 = inlined_call_operand.vmem [shape: f32[32,1], index: 3, kind: input, shape index: {}]   ;;  %s1190_s4 = inlined_call_operand.vmem [shape: f32[1,32], index: 4, kind: input, shape index: {}]   ;;  %s1191_s5 = inlined_call_operand.<no memory space> [shape: f32[1], index: 5, kind: input, shape index: {}]   ;;  %s1192_s6 = inlined_call_operand.hbm [shape: f32[1,2], index: 6, kind: output, shape index: {}]  }
   0x1   :  { %12 = vsyncpa [#allocation6], 0  ;;  %v875_v2 = vld [vmem:[%s1186_s0] sm:$0xff]  ;;  %v828_v13 = vmov 0   ;;  %v40_v14 = vld [vmem:[%s1189_s3 + $0x10] sm:$0xff]  ;;  %vm358_vm0 = vcmask 64512  }
   0x2   :  { %v867_v1 = vshrl.u32 %v43_v0, 7  ;;  %v92_v3 = vperm.slane %v875_v2, 2  ;;  %v67_v4 = vperm.slane %v875_v2, 1  ;;  %v42_v5 = vperm.slane %v875_v2, 0  ;;  %v38_v12 = vld [vmem:[%s1189_s3] sm:$0xff]  ;;  %v41_v15 = vld [vmem:[%s1189_s3 + $0x18] sm:$0xff] }
   0x3   :  { %v117_v7 = vperm.slane %v875_v2, 3  ;;  %v192_v10 = vperm.slane %v875_v2, 6  ;;  %v142_v11 = vperm.slane %v875_v2, 4  ;;  %v167_v16 = vperm.slane %v875_v2, 5  ;;  %v39_v17 = vld [vmem:[%s1189_s3 + $0x8] sm:$0xff]  ;;  %v931_v36 = vld [vmem:[%s1187_s1] sm:$0xff] }
   0x4   :  { %730 = vset.pattern.permute.xlu2 %v867_v1  ;;  %729 = vset.pattern.permute.xlu1 %v867_v1  ;;  %v51_v6 = vadd.s32 8, %v867_v1  ;;  %v883_v8 = vadd.s32 24, %v867_v1  ;;  %v57_v9 = vadd.s32 16, %v867_v1  ;;  %v217_v18 = vperm.slane %v875_v2, 7  ;;  %v936_v37 = vld [vmem:[%s1187_s1 + $0x8] sm:$0xff]  ;;  %v941_v38 = vld [vmem:[%s1187_s1 + $0x10] sm:$0xff] }
   0x5   :  { %728 = vset.pattern.permute.xlu0 %v867_v1  ;;  %vm553_vm1 = vcmask 1041409   ;;  %vm555_vm2 = vcmask 1042434   ;;  %vm557_vm3 = vcmask 1043459   ;;  %vm559_vm4 = vcmask 1044484   ;;  %s710_s18 = sshll.u32 %s1192_s6, 4  ;;  %s831_s20 = smov [#allocation5]   ;;  %s711_s18 = int_to_ptr.hbm [resolvable:$true] %s710_s18 }
   0x6   :  { %vm561_vm5 = vcmask 1045509   ;;  %vm563_vm6 = vcmask 1046534   ;;  %vm565_vm7 = vcmask 1047559   ;;  %vm30_vm8 = vcmask 7168  }
   0x7   :  { %vm667_vm9 = vcmask 261120  }
   0xc   :  { %97 = vperm.xlu2 %730, %v92_v3   ;;  %72 = vperm.xlu1 %729, %v67_v4  }
   0xd   :  { %47 = vperm.xlu0 %728, %v42_v5  }
  0x14   :  { %732 = vset.pattern.permute.xlu2 %v51_v6  ;;  %731 = vset.pattern.permute.xlu1 %v51_v6 }
  0x15   :  { %122 = vperm.xlu0 %728, %v117_v7  }
  0x1c   :  { %103 = vperm.xlu2 %732, %v92_v3   ;;  %78 = vperm.xlu1 %731, %v67_v4  }
  0x1d   :  { %738 = vset.pattern.permute.xlu0 %v883_v8 }
  0x24   :  { %734 = vset.pattern.permute.xlu2 %v57_v9  ;;  %733 = vset.pattern.permute.xlu1 %v57_v9 }
  0x25   :  { %65 = vperm.xlu0 %738, %v42_v5  }
  0x2c   :  { %84 = vperm.xlu2 %734, %v67_v4   ;;  %59 = vperm.xlu1 %733, %v42_v5  }
  0x2d   :  { %739 = vset.pattern.permute.xlu0 %v51_v6 }
  0x34   :  { %109 = vperm.xlu2 %734, %v92_v3   ;;  %735 = vset.pattern.permute.xlu1 %v51_v6 }
  0x35   :  { %53 = vperm.xlu0 %739, %v42_v5  }
  0x3c   :  { %737 = vset.pattern.permute.xlu2 %v51_v6  ;;  %128 = vperm.xlu1 %735, %v117_v7  }
  0x3d   :  { %203 = vperm.xlu0 %739, %v192_v10  }
  0x44   :  { %153 = vperm.xlu2 %737, %v142_v11   ;;  %736 = vset.pattern.permute.xlu1 %v867_v1 }
  0x45   :  { %748 = vset.pattern.permute.xlu0 %v828_v13 }
  0x46   :  { %308 = vperm.xlu0 %748, %v38_v12  }
  0x4c   :  { %741 = vset.pattern.permute.xlu2 %v57_v9  ;;  %147 = vperm.xlu1 %736, %v142_v11  }
  0x4e   :  { %318 = vperm.xlu0 %748, %v40_v14  }
  0x54   :  { %134 = vperm.xlu2 %741, %v117_v7   ;;  %740 = vset.pattern.permute.xlu1 %v883_v8 }
  0x56   :  { %323 = vperm.xlu0 %748, %v41_v15  }
  0x5c   :  { %743 = vset.pattern.permute.xlu2 %v51_v6  ;;  %90 = vperm.xlu1 %740, %v67_v4  }
  0x64   :  { %178 = vperm.xlu2 %743, %v167_v16   ;;  %742 = vset.pattern.permute.xlu1 %v867_v1 }
  0x66   :  { %v98_v22 = vpop.permute.xlu2 %97 }
  0x67   :  { %v250_v40 = vadd.f32 %v98_v22, %v931_v36 }
  0x69   :  { %v282_v49 = vmax.f32 %v250_v40, 0.0 }
  0x6c   :  { %745 = vset.pattern.permute.xlu2 %v883_v8  ;;  %172 = vperm.xlu1 %742, %v167_v16  }
  0x74   :  { %115 = vperm.xlu2 %745, %v92_v3   ;;  %744 = vset.pattern.permute.xlu1 %v828_v13 }
  0x75   :  { %313 = vperm.xlu1 %744, %v39_v17  }
  0x76   :  { %v104_v24 = vpop.permute.xlu2 %103 }
  0x77   :  { %v251_v44 = vadd.f32 %v104_v24, %v936_v37 }
  0x79   :  { %v283_v53 = vmax.f32 %v251_v44, 0.0 }
  0x7c   :  { %747 = vset.pattern.permute.xlu2 %v867_v1 }
  0x7d   :  { %746 = vset.pattern.permute.xlu1 %v57_v9 }
  0x7e   :  { %v73_v20 = vpop.permute.xlu1 %72 }
  0x7f   :  { %v910_v19 = vpop.permute.xlu0 %47  ;;  %v246_v41 = vadd.f32 %v73_v20, %v931_v36 }
  0x80   :  { %v242_v22 = vadd.f32 %v910_v19, %v931_v36 }
  0x81   :  { %v278_v50 = vmax.f32 %v246_v41, 0.0 }
  0x84   :  { %197 = vperm.xlu2 %747, %v192_v10  }
  0x85   :  { %159 = vperm.xlu1 %746, %v142_v11  }
  0x86   :  { %v85_v27 = vpop.permute.xlu2 %84 }
  0x87   :  { %v913_v21 = vpop.permute.xlu0 %122  ;;  %v248_v45 = vadd.f32 %v85_v27, %v941_v38 }
  0x88   :  { %v254_v40 = vadd.f32 %v913_v21, %v931_v36 }
  0x89   :  { %v280_v54 = vmax.f32 %v248_v45, 0.0 }
  0x8c   :  { %750 = vset.pattern.permute.xlu2 %v57_v9 }
  0x8d   :  { %749 = vset.pattern.permute.xlu1 %v883_v8 }
  0x8e   :  { %v79_v23 = vpop.permute.xlu1 %78  ;;  %v110_v31 = vpop.permute.xlu2 %109 }
  0x8f   :  { %v247_v46 = vadd.f32 %v79_v23, %v936_v37  ;;  %v252_v47 = vadd.f32 %v110_v31, %v941_v38 }
  0x91   :  { %v279_v55 = vmax.f32 %v247_v46, 0.0  ;;  %v284_v56 = vmax.f32 %v252_v47, 0.0  ;;  %v286_v46 = vmax.f32 %v254_v40, 0.0 }
  0x94   :  { %184 = vperm.xlu2 %750, %v167_v16  }
  0x95   :  { %140 = vperm.xlu1 %749, %v117_v7  }
  0x97   :  { %v915_v25 = vpop.permute.xlu0 %65 }
  0x9c   :  { %752 = vset.pattern.permute.xlu2 %v51_v6 }
  0x9d   :  { %751 = vset.pattern.permute.xlu1 %v867_v1 }
  0x9e   :  { %v917_v26 = vpop.permute.xlu1 %59  ;;  %v154_v34 = vpop.permute.xlu2 %153 }
  0x9f   :  { %v259_v48 = vadd.f32 %v154_v34, %v936_v37  ;;  %v991_v34 = vld [vmem:[%s1187_s1 + $0x18] sm:$0xff]  ;;  %v244_v19 = vadd.f32 %v917_v26, %v941_v38 }
  0xa0   :  { %v245_v41 = vadd.f32 %v915_v25, %v991_v34 }
  0xa1   :  { %v291_v59 = vmax.f32 %v259_v48, 0.0 }
  0xa2   :  { %v277_v47 = vmax.f32 %v245_v41, 0.0 }
  0xa4   :  { %228 = vperm.xlu2 %752, %v217_v18  }
  0xa5   :  { %222 = vperm.xlu1 %751, %v217_v18  }
  0xa7   :  { %v54_v28 = vpop.permute.xlu0 %53 }
  0xa8   :  { %v243_v23 = vadd.f32 %v54_v28, %v936_v37 }
  0xaa   :  { %v275_v31 = vmax.f32 %v243_v23, 0.0 }
  0xac   :  { %754 = vset.pattern.permute.xlu2 %v57_v9 }
  0xad   :  { %753 = vset.pattern.permute.xlu1 %v883_v8 }
  0xae   :  { %v920_v29 = vpop.permute.xlu1 %128  ;;  %v948_v43 = vpop.permute.xlu2 %134 }
  0xaf   :  { %v922_v32 = vpop.permute.xlu0 %203  ;;  %v255_v44 = vadd.f32 %v920_v29, %v936_v37 }
  0xb1   :  { %v287_v26 = vmax.f32 %v255_v44, 0.0 }
  0xb4   :  { %209 = vperm.xlu2 %754, %v192_v10  }
  0xb5   :  { %165 = vperm.xlu1 %753, %v142_v11  }
  0xb8   :  { %v926_v35 = vpop.permute.xlu0 %308 }
  0xb9   :  { %v330_v57 = vmul.f32 %v926_v35, %v278_v50  ;;  %v334_v58 = vmul.f32 %v926_v35, %v282_v49  ;;  %v276_v49 = vmax.f32 %v244_v19, 0.0 }
  0xbb   :  { %v372_v5 = vsel %vm358_vm0, %v330_v57, 0.0  ;;  %v385_v6 = vsel %vm358_vm0, %v334_v58, 0.0  ;;  %v338_v58 = vmul.f32 %v926_v35, %v286_v46 }
  0xbc   :  { %234 = vperm.xlu2 %754, %v217_v18  }
  0xbd   :  { %190 = vperm.xlu1 %753, %v167_v16  }
  0xbe   :  { %v148_v30 = vpop.permute.xlu1 %147  ;;  %v964_v0 = vpop.permute.xlu2 %178 }
  0xbf   :  { %v258_v42 = vadd.f32 %v148_v30, %v931_v36  ;;  %v274_v30 = vmax.f32 %v242_v22, 0.0 }
  0xc0   :  { %v955_v52 = vpop.permute.xlu0 %318 }
  0xc1   :  { %v290_v51 = vmax.f32 %v258_v42, 0.0  ;;  %v332_v60 = vmul.f32 %v955_v52, %v280_v54  ;;  %v336_v63 = vmul.f32 %v955_v52, %v284_v56  ;;  %v326_v28 = vmul.f32 %v926_v35, %v274_v30 }
  0xc2   :  { %v328_v54 = vmul.f32 %v955_v52, %v276_v49 }
  0xc3   :  { %v342_v62 = vmul.f32 %v926_v35, %v290_v51  ;;  %v375_v12 = vsel %vm358_vm0, %v332_v60, 0.0  ;;  %v359_v21 = vsel %vm358_vm0, %v326_v28, 0.0  ;;  %v256_v51 = vadd.f32 %v948_v43, %v941_v38 }
  0xc4   :  { %755 = vset.pattern.permute.xlu2 %v883_v8  ;;  %v362_v43 = vsel %vm358_vm0, %v328_v54, 0.0 }
  0xc5   :  { %215 = vperm.xlu1 %753, %v192_v10   ;;  %v411_v11 = vsel %vm358_vm0, %v342_v62, 0.0  ;;  %v288_v60 = vmax.f32 %v256_v51, 0.0 }
  0xcc   :  { %240 = vperm.xlu2 %755, %v217_v18  }
  0xcd   :  { %756 = vset.pattern.permute.xlu1 %v828_v13  ;;  %v388_v13 = vsel %vm358_vm0, %v336_v63, 0.0 }
  0xce   :  { %v924_v33 = vpop.permute.xlu1 %90  ;;  %v116_v18 = vpop.permute.xlu2 %115 }
  0xcf   :  { %v249_v25 = vadd.f32 %v924_v33, %v991_v34 }
  0xd1   :  { %v281_v33 = vmax.f32 %v249_v25, 0.0 }
  0xde   :  { %v943_v39 = vpop.permute.xlu1 %172  ;;  %v979_v20 = vpop.permute.xlu2 %197 }
  0xe7   :  { %v960_v61 = vpop.permute.xlu1 %313 }
  0xe8   :  { %v331_v1 = vmul.f32 %v960_v61, %v279_v55  ;;  %v335_v3 = vmul.f32 %v960_v61, %v283_v53  ;;  %v343_v4 = vmul.f32 %v960_v61, %v291_v59  ;;  %v327_v42 = vmul.f32 %v960_v61, %v275_v31  ;;  %v1012_v55 = vpop.permute.xlu0 %323 }
  0xe9   :  { %v253_v53 = vadd.f32 %v116_v18, %v991_v34  ;;  %v339_v57 = vmul.f32 %v960_v61, %v287_v26  ;;  %v329_v59 = vmul.f32 %v1012_v55, %v277_v47 }
  0xea   :  { %v373_v7 = vsel %vm358_vm0, %v331_v1, 0.0  ;;  %v386_v8 = vsel %vm358_vm0, %v335_v3, 0.0  ;;  %v412_v14 = vsel %vm358_vm0, %v343_v4, 0.0  ;;  %v360_v50 = vsel %vm358_vm0, %v327_v42, 0.0 }
  0xeb   :  { %v374_v9 = vadd.f32 %v373_v7, %v372_v5  ;;  %v387_v10 = vadd.f32 %v386_v8, %v385_v6  ;;  %v977_v17 = vadd.f32 %v412_v14, %v411_v11  ;;  %v361_v56 = vadd.f32 %v360_v50, %v359_v21 }
  0xec   :  { %v285_v62 = vmax.f32 %v253_v53, 0.0  ;;  %v399_v3 = vsel %vm358_vm0, %v339_v57, 0.0  ;;  %v398_v4 = vsel %vm358_vm0, %v338_v58, 0.0  ;;  %v333_v6 = vmul.f32 %v1012_v55, %v281_v33 }
  0xed   :  { %v376_v15 = vadd.f32 %v375_v12, %v374_v9  ;;  %v389_v16 = vadd.f32 %v388_v13, %v387_v10  ;;  %v363_v1 = vadd.f32 %v362_v43, %v361_v56  ;;  %v364_v7 = vsel %vm358_vm0, %v329_v59, 0.0 }
  0xee   :  { %v986_v27 = vpop.permute.xlu2 %184  ;;  %v340_v8 = vmul.f32 %v955_v52, %v288_v60  ;;  %v337_v9 = vmul.f32 %v1012_v55, %v285_v62  ;;  %v400_v11 = vadd.f32 %v399_v3, %v398_v4  ;;  %v377_v13 = vsel %vm358_vm0, %v333_v6, 0.0 }
  0xef   :  { %v365_v12 = vadd.f32 %v364_v7, %v363_v1  ;;  %v378_v23 = vadd.f32 %v377_v13, %v376_v15  ;;  %v1042_v58 = vadd.f32 %v922_v32, %v936_v37  ;;  %v264_v33 = vadd.f32 %v986_v27, %v941_v38 }
  0xf0   :  { %v401_v18 = vsel %vm358_vm0, %v340_v8, 0.0  ;;  %v390_v22 = vsel %vm358_vm0, %v337_v9, 0.0 }
  0xf1   :  { %v391_v31 = vadd.f32 %v390_v22, %v389_v16  ;;  %v402_v40 = vadd.f32 %v401_v18, %v400_v11  ;;  %v366_v19 = vrot.slane %v365_v12, 4  ;;  %v299_v27 = vmax.f32 %v1042_v58, 0.0 }
  0xf2   :  { %v296_v11 = vmax.f32 %v264_v33, 0.0 }
  0xf3   :  { %v392_v46 = vrot.slane %v391_v31, 4  ;;  %v367_v21 = vadd.f32 %v366_v19, %v365_v12 }
  0xf5   :  { %v393_v53 = vadd.f32 %v392_v46, %v391_v31  ;;  %v368_v54 = vrot.slane %v367_v21, 2 }
  0xf7   :  { %v984_v24 = vpop.permute.xlu1 %159  ;;  %v394_v62 = vrot.slane %v393_v53, 2  ;;  %v369_v1 = vadd.f32 %v368_v54, %v367_v21 }
  0xf8   :  { %v260_v15 = vadd.f32 %v984_v24, %v941_v38 }
  0xf9   :  { %v395_v12 = vadd.f32 %v394_v62, %v393_v53  ;;  %v370_v22 = vrot.slane %v369_v1, 1 }
  0xfb   :  { %v371_v21 = vadd.f32 %v370_v22, %v369_v1 }
  0xfe   :  { %v229_v48 = vpop.permute.xlu2 %228 }
  0xff   :  { %v271_v42 = vadd.f32 %v229_v48, %v936_v37  ;;  %v262_v48 = vadd.f32 %v943_v39, %v931_v36 }
 0x101   :  { %v303_v25 = vmax.f32 %v271_v42, 0.0  ;;  %v294_v3 = vmax.f32 %v262_v48, 0.0 }
 0x103   :  { %v355_v56 = vmul.f32 %v960_v61, %v303_v25  ;;  %v1072_v25 = vstv %s1191_s5 }
 0x105   :  { %v451_v32 = vsel %vm358_vm0, %v355_v56, 0.0 }
 0x107   :  { %v141_v45 = vpop.permute.xlu1 %140 }
 0x108   :  { %v257_v29 = vadd.f32 %v141_v45, %v991_v34  ;;  %v379_v45 = vrot.slane %v378_v23, 4 }
 0x10a   :  { %v289_v63 = vmax.f32 %v257_v29, 0.0  ;;  %v380_v16 = vadd.f32 %v379_v45, %v378_v23  ;;  %v292_v29 = vmax.f32 %v260_v15, 0.0  ;;  %v346_v23 = vmul.f32 %v926_v35, %v294_v3 }
 0x10c   :  { %v341_v10 = vmul.f32 %v1012_v55, %v289_v63  ;;  %v381_v24 = vrot.slane %v380_v16, 2  ;;  %v263_v63 = vadd.f32 %v964_v0, %v936_v37  ;;  %v344_v39 = vmul.f32 %v955_v52, %v292_v29 }
 0x10e   :  { %v1020_v5 = vpop.permute.xlu2 %209  ;;  %v403_v30 = vsel %vm358_vm0, %v341_v10, 0.0  ;;  %v382_v10 = vadd.f32 %v381_v24, %v380_v16  ;;  %v295_v13 = vmax.f32 %v263_v63, 0.0  ;;  %v1079_v24 = vadd.f32 %v1072_v25, %v371_v21 }
 0x10f   :  { %v404_v44 = vadd.f32 %v403_v30, %v402_v40  ;;  %v266_v30 = vadd.f32 %v979_v20, %v931_v36  ;;  %v351_v63 = vmul.f32 %v960_v61, %v299_v27 }
 0x110   :  { %v383_v42 = vrot.slane %v382_v10, 1 }
 0x111   :  { %v405_v50 = vrot.slane %v404_v44, 4  ;;  %v298_v15 = vmax.f32 %v266_v30, 0.0 }
 0x112   :  { %v384_v29 = vadd.f32 %v383_v42, %v382_v10 }
 0x113   :  { %v406_v57 = vadd.f32 %v405_v50, %v404_v44  ;;  %v348_v44 = vmul.f32 %v955_v52, %v296_v11  ;;  %v350_v33 = vmul.f32 %v926_v35, %v298_v15 }
 0x114   :  { %v1085_v1 = vadd.f32 %v1072_v25, %v384_v29 }
 0x115   :  { %v407_v4 = vrot.slane %v406_v57, 2 }
 0x116   :  { %v235_v28 = vpop.permute.xlu2 %234 }
 0x117   :  { %v223_v14 = vpop.permute.xlu1 %222  ;;  %v272_v49 = vadd.f32 %v235_v28, %v941_v38  ;;  %v408_v31 = vadd.f32 %v407_v4, %v406_v57 }
 0x118   :  { %v270_v41 = vadd.f32 %v223_v14, %v931_v36  ;;  %v414_v14 = vsel %vm358_vm0, %v344_v39, 0.0 }
 0x119   :  { %v304_v51 = vmax.f32 %v272_v49, 0.0  ;;  %v415_v45 = vadd.f32 %v414_v14, %v977_v17  ;;  %v268_v49 = vadd.f32 %v1020_v5, %v941_v38  ;;  %v409_v50 = vrot.slane %v408_v31, 1 }
 0x11a   :  { %v302_v47 = vmax.f32 %v270_v41, 0.0  ;;  %v347_v41 = vmul.f32 %v960_v61, %v295_v13  ;;  %v424_v38 = vsel %vm358_vm0, %v346_v23, 0.0  ;;  %v427_v5 = vsel %vm358_vm0, %v348_v44, 0.0 }
 0x11b   :  { %v356_v60 = vmul.f32 %v955_v52, %v304_v51  ;;  %v300_v56 = vmax.f32 %v268_v49, 0.0  ;;  %v437_v61 = vsel %vm358_vm0, %v350_v33, 0.0 }
 0x11c   :  { %v354_v26 = vmul.f32 %v926_v35, %v302_v47  ;;  %v396_v47 = vrot.slane %v395_v12, 1  ;;  %v425_v17 = vsel %vm358_vm0, %v347_v41, 0.0 }
 0x11d   :  { %v453_v37 = vsel %vm358_vm0, %v356_v60, 0.0  ;;  %v410_v60 = vadd.f32 %v409_v50, %v408_v31 }
 0x11e   :  { %v450_v59 = vsel %vm358_vm0, %v354_v26, 0.0  ;;  %v397_v48 = vadd.f32 %v396_v47, %v395_v12 }
 0x11f   :  { %v452_v8 = vadd.f32 %v451_v32, %v450_v59  ;;  %v426_v59 = vadd.f32 %v425_v17, %v424_v38  ;;  %v1095_v27 = vadd.f32 %v1072_v25, %v410_v60 }
 0x120   :  { %v1088_v4 = vadd.f32 %v1072_v25, %v397_v48 }
 0x121   :  { %v454_v19 = vadd.f32 %v453_v37, %v452_v8  ;;  %v428_v3 = vadd.f32 %v427_v5, %v426_v59  ;;  %v480_v8 = vand.u32 2147483647, %v1079_v24  ;;  %v438_v37 = vsel %vm358_vm0, %v351_v63, 0.0 }
 0x122   :  { %v439_v41 = vadd.f32 %v438_v37, %v437_v61 }
 0x123   :  { %v488_v31 = vsub.f32 0.0, %v480_v8 }
 0x126   :  { %v241_v43 = vpop.permute.xlu2 %240 }
 0x127   :  { %v273_v6 = vadd.f32 %v241_v43, %v991_v34  ;;  %v166_v7 = vpop.permute.xlu1 %165 }
 0x128   :  { %v261_v9 = vadd.f32 %v166_v7, %v991_v34 }
 0x129   :  { %v305_v0 = vmax.f32 %v273_v6, 0.0  ;;  %v352_v6 = vmul.f32 %v955_v52, %v300_v56  ;;  %v481_v52 = vand.u32 2147483647, %v1085_v1 }
 0x12a   :  { %v293_v18 = vmax.f32 %v261_v9, 0.0 }
 0x12b   :  { %v357_v40 = vmul.f32 %v1012_v55, %v305_v0  ;;  %v440_v22 = vsel %vm358_vm0, %v352_v6, 0.0  ;;  %v489_v44 = vsub.f32 0.0, %v481_v52 }
 0x12c   :  { %v345_v28 = vmul.f32 %v1012_v55, %v293_v18  ;;  %v482_v18 = vand.u32 2147483647, %v1088_v4 }
 0x12d   :  { %v455_v46 = vsel %vm358_vm0, %v357_v40, 0.0  ;;  %v483_v40 = vand.u32 2147483647, %v1095_v27 }
 0x12e   :  { %v456_v36 = vadd.f32 %v455_v46, %v454_v19  ;;  %v416_v20 = vsel %vm358_vm0, %v345_v28, 0.0 }
 0x12f   :  { %v417_v16 = vadd.f32 %v416_v20, %v415_v45  ;;  %v191_v26 = vpop.permute.xlu1 %190  ;;  %v496_v20 = vmul.f32 1.442695, %v488_v31  ;;  %v491_v21 = vsub.f32 0.0, %v483_v40 }
 0x130   :  { %v457_v51 = vrot.slane %v456_v36, 4  ;;  %v265_v53 = vadd.f32 %v191_v26, %v991_v34  ;;  %v498_v26 = vmul.f32 1.442695, %v489_v44  ;;  %v472_v44 = vmax.f32 %v1079_v24, 0.0 }
 0x131   :  { %v418_v54 = vrot.slane %v417_v16, 4  ;;  %v502_v38 = vmul.f32 1.442695, %v491_v21  ;;  %758 = vpow2.f32 %v496_v20 }
 0x132   :  { %v458_v57 = vadd.f32 %v457_v51, %v456_v36  ;;  %v297_v58 = vmax.f32 %v265_v53, 0.0  ;;  %v490_v36 = vsub.f32 0.0, %v482_v18  ;;  %760 = vpow2.f32 %v498_v26 }
 0x133   :  { %v419_v62 = vadd.f32 %v418_v54, %v417_v16  ;;  %v475_v26 = vmax.f32 %v1095_v27, 0.0 }
 0x134   :  { %v459_v39 = vrot.slane %v458_v57, 2  ;;  %v349_v43 = vmul.f32 %v1012_v55, %v297_v58  ;;  %v500_v29 = vmul.f32 1.442695, %v490_v36 }
 0x135   :  { %v420_v32 = vrot.slane %v419_v62, 2 }
 0x136   :  { %v460_v7 = vadd.f32 %v459_v39, %v458_v57  ;;  %v429_v35 = vsel %vm358_vm0, %v349_v43, 0.0  ;;  %762 = vpow2.f32 %v500_v29 }
 0x137   :  { %v421_v9 = vadd.f32 %v420_v32, %v419_v62  ;;  %v430_v10 = vadd.f32 %v429_v35, %v428_v3  ;;  %v216_v11 = vpop.permute.xlu1 %215  ;;  %764 = vpow2.f32 %v502_v38  ;;  %v759_v60 = vpop.eup %758 }
 0x138   :  { %v461_v0 = vrot.slane %v460_v7, 1  ;;  %v269_v12 = vadd.f32 %v216_v11, %v991_v34  ;;  %v441_v34 = vadd.f32 %v440_v22, %v439_v41  ;;  %v761_v39 = vpop.eup %760 }
 0x139   :  { %v422_v13 = vrot.slane %v421_v9, 1  ;;  %v431_v14 = vrot.slane %v430_v10, 4  ;;  %v513_v61 = vadd.f32 1.0, %v761_v39 }
 0x13a   :  { %v301_v23 = vmax.f32 %v269_v12, 0.0  ;;  %v462_v30 = vadd.f32 %v461_v0, %v460_v7  ;;  %v512_v7 = vadd.f32 1.0, %v759_v60 }
 0x13b   :  { %v423_v19 = vadd.f32 %v422_v13, %v421_v9  ;;  %v432_v28 = vadd.f32 %v431_v14, %v430_v10 }
 0x13c   :  { %v353_v42 = vmul.f32 %v1012_v55, %v301_v23  ;;  %v1109_v49 = vadd.f32 %v1072_v25, %v462_v30  ;;  %v763_v6 = vpop.eup %762 }
 0x13d   :  { %v1105_v45 = vadd.f32 %v1072_v25, %v423_v19  ;;  %v433_v46 = vrot.slane %v432_v28, 2  ;;  %v765_v35 = vpop.eup %764  ;;  %v514_v11 = vadd.f32 1.0, %v763_v6 }
 0x13e   :  { %v442_v47 = vsel %vm358_vm0, %v353_v42, 0.0  ;;  %v487_v53 = vand.u32 2147483647, %v1109_v49  ;;  %v515_v37 = vadd.f32 1.0, %v765_v35  ;;  %v830_v35 = vmov 0.0  }
 0x13f   :  { %v484_v15 = vand.u32 2147483647, %v1105_v45  ;;  %v434_v50 = vadd.f32 %v433_v46, %v432_v28  ;;  %v443_v16 = vadd.f32 %v442_v47, %v441_v34  ;;  %v473_v34 = vmax.f32 %v1085_v1, 0.0  ;;  %32 = vst.msk [vmem:[#allocation3] sm:$0xff] %vm30_vm8, %v830_v35 }
 0x140   :  { %v495_v58 = vsub.f32 0.0, %v487_v53  ;;  %v476_v24 = vmax.f32 %v1105_v45, 0.0 }
 0x141   :  { %v492_v55 = vsub.f32 0.0, %v484_v15  ;;  %v435_v17 = vrot.slane %v434_v50, 1  ;;  %v444_v51 = vrot.slane %v443_v16, 4 }
 0x142   :  { %v510_v43 = vmul.f32 1.442695, %v495_v58 }
 0x143   :  { %v436_v5 = vadd.f32 %v435_v17, %v434_v50  ;;  %v445_v54 = vadd.f32 %v444_v51, %v443_v16  ;;  %v504_v48 = vmul.f32 1.442695, %v492_v55  ;;  %v474_v50 = vmax.f32 %v1088_v4, 0.0 }
 0x145   :  { %v1114_v56 = vadd.f32 %v1072_v25, %v436_v5  ;;  %v446_v57 = vrot.slane %v445_v54, 2  ;;  %766 = vpow2.f32 %v504_v48 }
 0x147   :  { %v485_v33 = vand.u32 2147483647, %v1114_v56  ;;  %v447_v59 = vadd.f32 %v446_v57, %v445_v54  ;;  %v477_v51 = vmax.f32 %v1114_v56, 0.0  ;;  %v479_v56 = vmax.f32 %v1109_v49, 0.0  ;;  %v658_v49 = vld [vmem:[%s1188_s2] sm:$0xff] }
 0x149   :  { %v493_v62 = vsub.f32 0.0, %v485_v33  ;;  %v448_v63 = vrot.slane %v447_v59, 1 }
 0x14b   :  { %v449_v3 = vadd.f32 %v448_v63, %v447_v59  ;;  %v506_v32 = vmul.f32 1.442695, %v493_v62  ;;  %v767_v9 = vpop.eup %766 }
 0x14c   :  { %v516_v12 = vadd.f32 1.0, %v767_v9 }
 0x14d   :  { %v1118_v8 = vadd.f32 %v1072_v25, %v449_v3  ;;  %768 = vpow2.f32 %v506_v32  ;;  %v660_v3 = vadd.f32 %v658_v49, %v875_v2  ;;  %v757_v32 = vld [vmem:[%s1190_s4] ss:$0 sm:$0xff] }
 0x14e   :  { %770 = vpow2.f32 %v510_v43  ;;  %v829_v43 = vmov -inf  }
 0x14f   :  { %v486_v10 = vand.u32 2147483647, %v1118_v8  ;;  %772 = vlog2.f32 %v512_v7  ;;  %v478_v27 = vmax.f32 %v1118_v8, 0.0  ;;  %31 = vst.msk [vmem:[#allocation2] sm:$0xff] %vm30_vm8, %v829_v43  ;;  %v661_v6 = vmax.f32 %v660_v3, 0.0 }
 0x150   :  { %774 = vlog2.f32 %v513_v61 }
 0x151   :  { %v494_v0 = vsub.f32 0.0, %v486_v10  ;;  %776 = vlog2.f32 %v514_v11  ;;  %v666_v7 = vmul.f32 %v757_v32, %v661_v6 }
 0x152   :  { %778 = vlog2.f32 %v515_v37 }
 0x153   :  { %v769_v52 = vpop.eup %768  ;;  %v508_v13 = vmul.f32 1.442695, %v494_v0  ;;  %v668_v8 = vsel %vm667_vm9, %v666_v7, 0.0 }
 0x154   :  { %v771_v14 = vpop.eup %770  ;;  %v517_v18 = vadd.f32 1.0, %v769_v52  ;;  %669 = vadd.xlane.f32.xlu2 %v668_v8 }
 0x155   :  { %780 = vpow2.f32 %v508_v13  ;;  %v773_v22 = vpop.eup %772  ;;  %v519_v30 = vadd.f32 1.0, %v771_v14 }
 0x156   :  { %782 = vlog2.f32 %v516_v12  ;;  %v775_v23 = vpop.eup %774  ;;  %v521_v41 = vmul.f32 0.6931472, %v773_v22  ;;  %v1152_v61 = vld [vmem:[#allocation2] sm:$0xff] }
 0x157   :  { %784 = vlog2.f32 %v517_v18  ;;  %v777_v31 = vpop.eup %776  ;;  %v523_v19 = vmul.f32 0.6931472, %v775_v23 }
 0x158   :  { %v779_v40 = vpop.eup %778  ;;  %786 = vlog2.f32 %v519_v30  ;;  %v525_v36 = vmul.f32 0.6931472, %v777_v31  ;;  %v1123_v21 = vadd.f32 %v521_v41, %v472_v44 }
 0x159   :  { %v527_v20 = vmul.f32 0.6931472, %v779_v40  ;;  %v1125_v15 = vadd.f32 %v523_v19, %v473_v34 }
 0x15a   :  { %v538_v1 = vadd.f32 %v525_v36, %v474_v50 }
 0x15b   :  { %v781_v28 = vpop.eup %780  ;;  %v539_v53 = vadd.f32 %v527_v20, %v475_v26  ;;  %v554_v29 = vsel %vm553_vm1, %v1125_v15, %v1123_v21 }
 0x15c   :  { %v783_v42 = vpop.eup %782  ;;  %v518_v46 = vadd.f32 1.0, %v781_v28  ;;  %v556_v45 = vsel %vm555_vm2, %v538_v1, %v554_v29 }
 0x15d   :  { %v785_v47 = vpop.eup %784  ;;  %v529_v16 = vmul.f32 0.6931472, %v783_v42  ;;  %v558_v57 = vsel %vm557_vm3, %v539_v53, %v556_v45 }
 0x15e   :  { %788 = vlog2.f32 %v518_v46  ;;  %v531_v55 = vmul.f32 0.6931472, %v785_v47  ;;  %v787_v17 = vpop.eup %786 }
 0x15f   :  { %v540_v38 = vadd.f32 %v529_v16, %v476_v24  ;;  %v535_v5 = vmul.f32 0.6931472, %v787_v17 }
 0x160   :  { %v541_v54 = vadd.f32 %v531_v55, %v477_v51 }
 0x161   :  { %v560_v33 = vsel %vm559_vm4, %v540_v38, %v558_v57  ;;  %v543_v59 = vadd.f32 %v535_v5, %v479_v56 }
 0x162   :  { %v562_v60 = vsel %vm561_vm5, %v541_v54, %v560_v33 }
 0x164   :  { %v789_v4 = vpop.eup %788 }
 0x165   :  { %v533_v48 = vmul.f32 0.6931472, %v789_v4 }
 0x167   :  { %v542_v58 = vadd.f32 %v533_v48, %v478_v27 }
 0x169   :  { %v564_v62 = vsel %vm563_vm6, %v542_v58, %v562_v60 }
 0x16a   :  { %v566_v63 = vsel %vm565_vm7, %v543_v59, %v564_v62 }
 0x16b   :  { %v568_v39 = vsel %vm358_vm0, %v566_v63, -inf }
 0x16c   :  { %569 = vmax.xlane.f32.xlu0 %v568_v39 }
 0x1c7   :  { %v670_v11 = vpop.xlane.xlu2 %669 }
 0x1c8   :  { %v1163_v37 = vadd.f32 %v670_v11, %v1072_v25  ;;  %v572_v11 = vld [vmem:[#allocation3] sm:$0xff] }
 0x1ca   :  { %v673_v0 = vand.u32 2147483647, %v1163_v37  ;;  %v672_v39 = vmax.f32 %v1163_v37, 0.0 }
 0x1cc   :  { %v674_v12 = vsub.f32 0.0, %v673_v0 }
 0x1ce   :  { %v675_v13 = vmul.f32 1.442695, %v674_v12 }
 0x1df   :  { %v570_v9 = vpop.xlane.xlu0 %569 }
 0x1e0   :  { %v1155_v10 = vmax.f32 %v1152_v61, %v570_v9 }
 0x1e2   :  { %v573_v2 = vsub.f32 %v1152_v61, %v1155_v10  ;;  %649 = vst.msk [vmem:[#allocation2] sm:$0xff] %vm30_vm8, %v1155_v10  ;;  %579 = vperm.xlu1 %756, %v1155_v10  }
 0x1e4   :  { %v574_v8 = vmul.f32 1.442695, %v573_v2 }
 0x1e9   :  { %v653_v2 = vld [vmem:[#allocation2] sm:$0xff] }
 0x254   :  { %v580_v52 = vpop.permute.xlu1 %579 }
 0x255   :  { %v581_v14 = vrot.slane %v580_v52, 1  ;;  %v582_v18 = vrot.slane %v580_v52, 2  ;;  %v596_v22 = vsub.f32 %v1123_v21, %v580_v52  ;;  %v583_v23 = vrot.slane %v580_v52, 3 }
 0x256   :  { %v584_v30 = vrot.slane %v580_v52, 4  ;;  %v585_v31 = vrot.slane %v580_v52, 5  ;;  %v586_v40 = vrot.slane %v580_v52, 6  ;;  %v587_v41 = vrot.slane %v580_v52, 7 }
 0x257   :  { %v597_v19 = vsub.f32 %v1125_v15, %v581_v14  ;;  %v604_v28 = vmul.f32 1.442695, %v596_v22  ;;  %v598_v42 = vsub.f32 %v538_v1, %v582_v18  ;;  %v599_v25 = vsub.f32 %v539_v53, %v583_v23 }
 0x258   :  { %v600_v44 = vsub.f32 %v540_v38, %v584_v30  ;;  %v601_v34 = vsub.f32 %v541_v54, %v585_v31  ;;  %v602_v46 = vsub.f32 %v542_v58, %v586_v40  ;;  %v603_v47 = vsub.f32 %v543_v59, %v587_v41 }
 0x259   :  { %790 = vpow2.f32 %v604_v28  ;;  %v606_v36 = vmul.f32 1.442695, %v597_v19  ;;  %v608_v20 = vmul.f32 1.442695, %v598_v42  ;;  %v610_v50 = vmul.f32 1.442695, %v599_v25 }
 0x25a   :  { %v612_v16 = vmul.f32 1.442695, %v600_v44  ;;  %792 = vpow2.f32 %v675_v13  ;;  %v614_v21 = vmul.f32 1.442695, %v601_v34  ;;  %v616_v26 = vmul.f32 1.442695, %v602_v46 }
 0x25b   :  { %794 = vpow2.f32 %v606_v36  ;;  %v618_v55 = vmul.f32 1.442695, %v603_v47 }
 0x25c   :  { %796 = vpow2.f32 %v608_v20 }
 0x25d   :  { %798 = vpow2.f32 %v610_v50 }
 0x25e   :  { %800 = vpow2.f32 %v612_v16 }
 0x25f   :  { %v791_v15 = vpop.eup %790  ;;  %802 = vpow2.f32 %v614_v21 }
 0x260   :  { %v793_v17 = vpop.eup %792  ;;  %804 = vpow2.f32 %v616_v26 }
 0x261   :  { %v795_v24 = vpop.eup %794  ;;  %806 = vpow2.f32 %v618_v55  ;;  %v677_v1 = vadd.f32 1.0, %v793_v17 }
 0x262   :  { %v797_v51 = vpop.eup %796  ;;  %v628_v53 = vrot.slane %v795_v24, 7 }
 0x263   :  { %v799_v29 = vpop.eup %798  ;;  %v630_v38 = vrot.slane %v797_v51, 6  ;;  %808 = vlog2.f32 %v677_v1 }
 0x264   :  { %v801_v4 = vpop.eup %800  ;;  %v629_v5 = vsel %vm553_vm1, %v628_v53, %v791_v15  ;;  %v632_v54 = vrot.slane %v799_v29, 5  ;;  %810 = vpow2.f32 %v574_v8 }
 0x265   :  { %v803_v27 = vpop.eup %802  ;;  %v631_v48 = vsel %vm555_vm2, %v630_v38, %v629_v5  ;;  %v634_v45 = vrot.slane %v801_v4, 4 }
 0x266   :  { %v805_v56 = vpop.eup %804  ;;  %v633_v57 = vsel %vm557_vm3, %v632_v54, %v631_v48  ;;  %v636_v58 = vrot.slane %v803_v27, 3 }
 0x267   :  { %v807_v33 = vpop.eup %806  ;;  %v635_v59 = vsel %vm559_vm4, %v634_v45, %v633_v57  ;;  %v638_v60 = vrot.slane %v805_v56, 2 }
 0x268   :  { %v637_v62 = vsel %vm561_vm5, %v636_v58, %v635_v59  ;;  %v640_v63 = vrot.slane %v807_v33, 1 }
 0x269   :  { %v809_v43 = vpop.eup %808  ;;  %v639_v49 = vsel %vm563_vm6, %v638_v60, %v637_v62 }
 0x26a   :  { %v641_v3 = vsel %vm565_vm7, %v640_v63, %v639_v49  ;;  %v679_v32 = vmul.f32 0.6931472, %v809_v43  ;;  %v811_v9 = vpop.eup %810 }
 0x26b   :  { %v643_v6 = vsel %vm358_vm0, %v641_v3, 0.0  ;;  %v576_v37 = vmul.f32 %v811_v9, %v572_v11 }
 0x26c   :  { %644 = vadd.xlane.f32.xlu1 %v643_v6  ;;  %v680_v7 = vadd.f32 %v679_v32, %v672_v39 }
 0x26e   :  { %v681_v35 = vsel %vm30_vm8, %v680_v7, 0.0 }
 0x26f   :  { %682 = vadd.xlane.f32.xlu2 %v681_v35 }
 0x2df   :  { %v645_v0 = vpop.xlane.xlu1 %644 }
 0x2e0   :  { %v646_v12 = vadd.f32 %v645_v0, %v576_v37 }
 0x2e2   :  { %648 = vst.msk [vmem:[#allocation3] sm:$0xff] %vm30_vm8, %v646_v12  ;;  %v683_v52 = vpop.xlane.xlu2 %682 }
 0x2e3   :  { %v684_v13 = vrot.slane %v683_v52, 4 }
 0x2e5   :  { %v685_v14 = vadd.f32 %v684_v13, %v683_v52 }
 0x2e7   :  { %v686_v18 = vrot.slane %v685_v14, 2 }
 0x2e9   :  { %v654_v22 = vld [vmem:[#allocation3] sm:$0xff]  ;;  %v687_v23 = vadd.f32 %v686_v18, %v685_v14 }
 0x2ea   :  { %812 = vlog2.f32 %v654_v22 }
 0x2eb   :  { %v688_v30 = vrot.slane %v687_v23, 1 }
 0x2ed   :  { %v689_v31 = vadd.f32 %v688_v30, %v687_v23 }
 0x2ef   :  { %720 = vpush %v689_v31 }
 0x2f0   :  { %v813_v61 = vpop.eup %812 }
 0x2f1   :  { %v656_v10 = vmul.f32 0.6931472, %v813_v61 }
 0x2f3   :  { %v657_v40 = vadd.f32 %v656_v10, %v653_v2 }
 0x2f5   :  { %v693_v41 = vsel %vm30_vm8, %v657_v40, 0.0 }
 0x2f6   :  { %694 = vadd.xlane.f32.xlu0 %v693_v41 }
 0x320   :  { %s721_s2 = spop %720 }
 0x321   :  { %692 = sst [smem:[#allocation5]] %s721_s2 }
 0x369   :  { %v695_v19 = vpop.xlane.xlu0 %694 }
 0x36a   :  { %v696_v28 = vrot.slane %v695_v19, 4 }
 0x36c   :  { %v697_v42 = vadd.f32 %v696_v28, %v695_v19 }
 0x36e   :  { %v698_v25 = vrot.slane %v697_v42, 2 }
 0x370   :  { %v699_v44 = vadd.f32 %v698_v25, %v697_v42 }
 0x372   :  { %v700_v34 = vrot.slane %v699_v44, 1 }
 0x374   :  { %v701_v46 = vadd.f32 %v700_v34, %v699_v44 }
 0x376   :  { %722 = vpush %v701_v46 }
 0x3a7   :  { %s723_s19 = spop %722 }
 0x3a8   :  { %704 = sst [smem:[#allocation5 + $0x1]] %s723_s19 }
 0x3a9   :  { %713 = dma.smem_to_hbm %s831_s20, 16, %s711_s18, [#allocation6]  }
 0x3aa   :  { %826 = dma.done.wait [#allocation6], 16  }
 0x3ab   :  { %827 = vsyncadd [#allocation6], 4294967280 }
 0x3ac   :  { %718 = sfence }
 0x3ad   :  { %719 = vsyncpa [#allocation6], 1 }

</bundles_post_ra>
